<compile_context>
chip_gen: v5e
topology: v5e:2x2
jax: 0.10.0
libtpu: 0.0.40
codegen_flags: <defaults>
</compile_context>

<pallas_src>
import functools

import jax
import jax.numpy as jnp
from jax import lax
from jax.experimental import pallas as pl
from jax.experimental.pallas import tpu as pltpu


def _simclr_kernel(x_row_ref, x_col_ref, x_pos_ref, o_ref, acc_ref,
                   *, acc_groups: int):
    j = pl.program_id(1)
    nj = pl.num_programs(1)

    @pl.when(j == 0)
    def _init():
        acc_ref[...] = jnp.zeros_like(acc_ref)

    xr = x_row_ref[...]          # (Tr, Dp), already normalized * sqrt(1/T)
    xc = x_col_ref[...]          # (Tc, Dp), same preprocessing

    # (Tr, Tc) similarity tile on the MXU; contract D on BOTH operands so no
    # transpose of the column block is materialized.  Result already carries
    # the full 1/temperature factor (sqrt folded into each operand).
    sims = lax.dot_general(
        xr, xc,
        dimension_numbers=(((1,), (1,)), ((), ())),
        preferred_element_type=jnp.float32)

    # TODO(synk): no running-max / logsumexp (matches the reference module);
    # similarity='dot' with very large-magnitude features can overflow exp().
    e = jnp.exp(sims)            # (Tr, Tc) f32

    # Lane-dense accumulation: full-vreg VALU adds of 128-lane groups; the
    # cross-lane XLU reduce happens once, at finalize.
    acc_w = acc_ref.shape[1]
    partial = e[:, 0:acc_w]
    for g in range(1, acc_groups):
        partial = partial + e[:, g * acc_w:(g + 1) * acc_w]
    acc_ref[...] += partial

    @pl.when(j == nj - 1)
    def _finalize():
        xr32 = xr.astype(jnp.float32)
        xp32 = x_pos_ref[...].astype(jnp.float32)
        # Self term computed from the SAME stored (possibly bf16) values the
        # MXU consumed, so it cancels the diagonal inside the accumulated
        # denominator up to accumulation order.
        self_logit = jnp.sum(xr32 * xr32, axis=-1, keepdims=True)   # <x_i,x_i>/T
        pos_logit = jnp.sum(xr32 * xp32, axis=-1, keepdims=True)    # <x_i,x_pos>/T
        denom = jnp.sum(acc_ref[...], axis=1, keepdims=True) - jnp.exp(self_logit)
        # -log(exp(pos_logit) / denom) == log(denom) - pos_logit
        o_ref[...] = jnp.log(denom) - pos_logit


def _vmem_budget():
    """Device-derived (tile_budget, vmem_limit) in bytes."""
    try:
        info = pltpu.get_tpu_info()
        phys = int(getattr(info, "vmem_capacity_bytes", 0)) or (64 << 20)
    except Exception:
        phys = 64 << 20  # conservative (v7x-sized) fallback
    tile_budget = phys // 2            # ~64 MiB on v5e/v6e, ~32 MiB on v7x
    vmem_limit = (phys * 3) // 4       # ~96 MiB on v5e/v6e, ~48 MiB on v7x
    return int(tile_budget), int(vmem_limit)


def _pick_tiles(m: int, d_padded: int, itemsize: int, budget_bytes: int):
    """Pick (Tr, Tc): largest row tile (prefer >=4 row blocks for v7x's two
    TensorCores), column tile 512/256/128, both fitting the VMEM budget."""
    def fits(tr, tc):
        blocks = 2 * (2 * tr * d_padded + tc * d_padded) * itemsize  # dbl-buffered row/pos/col
        out = 2 * tr * 4
        scratch = tr * 128 * 4
        temps = 3 * tr * tc * 4 + 2 * tr * d_padded * 4              # sims/exp/partial + f32 upcasts
        return blocks + out + scratch + temps <= budget_bytes

    row_cands = [t for t in (4096, 2048, 1024, 512, 256, 128, 64, 32, 16, 8)
                 if m % t == 0] or [m]
    col_cands = [t for t in (512, 256, 128) if m % t == 0] or [m]

    for min_blocks in (4, 2, 1):
        for tr in row_cands:
            if m // tr < min_blocks:
                continue
            for tc in col_cands:
                if fits(tr, tc):
                    return tr, tc
    return min(row_cands), min(col_cands)


def simclr_loss(x: jax.Array, temperature: float, similarity: str = "cos",
                precision: str = "bf16") -> jax.Array:
    """Pallas implementation of SimClrLoss.forward (debug=False path)."""
    assert x.ndim == 2, "input must be 2-D (2N, D)"
    assert x.shape[0] % 2 == 0, "number of samples must be even"
    assert similarity in ("cos", "dot")
    assert precision in ("bf16", "f32")
    M, D = x.shape
    N = M // 2

    # --- one mem-bound preprocessing pass in the wrapper -------------------
    xf = x.astype(jnp.float32)
    if similarity == "cos":
        nrm = jnp.sqrt(jnp.sum(xf * xf, axis=-1, keepdims=True))
        xf = xf / jnp.maximum(nrm, 1e-12)
    # Fold sqrt(1/T) into BOTH operands so sims, the positive logit and the
    # self term all carry 1/temperature with zero per-iteration scaling.
    xf = xf * jnp.sqrt(jnp.float32(1.0 / float(temperature)))

    store_dtype = jnp.bfloat16 if precision == "bf16" else jnp.float32
    xs = xf.astype(store_dtype)

    # Pad the feature axis to a multiple of 128 lanes (zero padding changes
    # neither dot products nor norms).
    Dp = max(128, ((D + 127) // 128) * 128)
    if Dp != D:
        xs = jnp.pad(xs, ((0, 0), (0, Dp - D)))

    tile_budget, vmem_limit = _vmem_budget()
    Tr, Tc = _pick_tiles(M, Dp, jnp.dtype(store_dtype).itemsize, tile_budget)
    nb_rows = M // Tr

    # Positive partner of row i is row (i + N) % 2N.  When the row tile
    # divides N, gather positives straight from x via the index_map (no extra
    # HBM copy); otherwise fall back to a rolled copy (tiny / odd shapes).
    if N % Tr == 0:
        pos_operand = xs
        shift = N // Tr
        pos_index_map = lambda i, j: ((i + shift) % nb_rows, 0)
    else:
        pos_operand = jnp.roll(xs, shift=-N, axis=0)
        pos_index_map = lambda i, j: (i, 0)

    acc_w = 128 if (Tc % 128 == 0) else Tc
    acc_groups = Tc // acc_w

    kernel = functools.partial(_simclr_kernel, acc_groups=acc_groups)

    per_row = pl.pallas_call(
        kernel,
        out_shape=jax.ShapeDtypeStruct((M, 1), jnp.float32),
        grid_spec=pltpu.PrefetchScalarGridSpec(
            num_scalar_prefetch=0,
            grid=(nb_rows, M // Tc),
            in_specs=[
                pl.BlockSpec((Tr, Dp), lambda i, j: (i, 0)),  # row block
                pl.BlockSpec((Tc, Dp), lambda i, j: (j, 0)),  # streamed col block
                pl.BlockSpec((Tr, Dp), pos_index_map),        # positive rows
            ],
            out_specs=pl.BlockSpec((Tr, 1), lambda i, j: (i, 0)),
            scratch_shapes=[pltpu.VMEM((Tr, acc_w), jnp.float32)],
        ),
        compiler_params=pltpu.CompilerParams(
            dimension_semantics=("parallel", "arbitrary"),
            vmem_limit_bytes=vmem_limit,
        ),
    )(xs, xs, pos_operand)

    return jnp.mean(per_row)


def _simclr_loss_ref(x, temperature, similarity="cos"):
    """Pure-JAX reference mirroring the PyTorch module."""
    x = x.astype(jnp.float32)
    M = x.shape[0]
    N = M // 2
    if similarity == "cos":
        xn = x / jnp.maximum(jnp.linalg.norm(x, axis=-1, keepdims=True), 1e-12)
    else:
        xn = x
    e = jnp.exp(xn @ xn.T / temperature)
    p1 = jnp.arange(M)
    p2 = (p1 + N) % M
    pos = e[p1, p2][:, None]
    denom = jnp.sum(e, axis=1, keepdims=True) - jnp.diag(e)[:, None]
    return jnp.mean(-jnp.log(pos / denom))


if __name__ == "__main__":
    key = jax.random.PRNGKey(0)
    temperature = 0.5
    k1, k2 = jax.random.split(key)

    # Small shape consistent with the module's 2-D (2N, D) contract.
    x_small = jax.random.normal(k1, (8, 32), dtype=jnp.float32)   # 2N=8, D=32
    # Larger shape exercising the multi-block tiled path (Tr=256, Tc=512).
    x_big = jax.random.normal(k2, (1024, 64), dtype=jnp.float32)
    # Scaled copy for the 'dot' path so exp() stays well-conditioned.
    x_dot = x_small * 0.2

    # Exact-precision checks (f32 operands).
    strict_checks = [(x_small, "cos"), (x_dot, "dot"), (x_big, "cos")]
    for xi, sim in strict_checks:
        out = jax.block_until_ready(
            simclr_loss(xi, temperature, similarity=sim, precision="f32"))
        ref = jax.block_until_ready(_simclr_loss_ref(xi, temperature, sim))
        assert jnp.allclose(out, ref, rtol=1e-4, atol=1e-4), (sim, xi.shape, out, ref)

    # Default bf16 MXU path (looser tolerance).
    out_bf16 = jax.block_until_ready(
        simclr_loss(x_big, temperature, similarity="cos"))
    ref_big = jax.block_until_ready(_simclr_loss_ref(x_big, temperature, "cos"))
    assert jnp.allclose(out_bf16, ref_big, rtol=5e-2, atol=5e-2), (out_bf16, ref_big)

    print("KERNEL_OK")
</pallas_src>

<mosaic_0001>
module attributes {stable_mosaic.version = 11 : i64} {
  func.func @_simclr_kernel(%arg0: i32, %arg1: i32, %arg2: memref<8x128xf32, #tpu.memory_space<vmem>>, %arg3: memref<8x128xf32, #tpu.memory_space<vmem>>, %arg4: memref<8x128xf32, #tpu.memory_space<vmem>>, %arg5: memref<8x1xf32, #tpu.memory_space<vmem>>, %arg6: memref<8x8xf32, #tpu.memory_space<vmem>>) attributes {dimension_semantics = [#tpu.dimension_semantics<parallel>, #tpu.dimension_semantics<arbitrary>], iteration_bounds = array<i64: 1, 1>, scalar_prefetch = 0 : i64, scratch_operands = 1 : i64, tpu.core_type = #tpu.core_type<tc>, window_params = [{transform_indices = @transform_0, window_bounds = array<i64: 8, 128>}, {transform_indices = @transform_1, window_bounds = array<i64: 8, 128>}, {transform_indices = @transform_2, window_bounds = array<i64: 8, 128>}, {transform_indices = @transform_3, window_bounds = array<i64: 8, 1>}]} {
    %c0_i32 = arith.constant 0 : i32
    %0 = arith.cmpi eq, %arg1, %c0_i32 : i32
    %1 = arith.extui %0 : i1 to i32
    %c0_i32_0 = arith.constant 0 : i32
    %2 = arith.cmpi ne, %1, %c0_i32_0 : i32
    scf.if %2 {
      %cst_10 = arith.constant 0.000000e+00 : f32
      %13 = vector.broadcast %cst_10 : f32 to vector<8x8xf32>
      %c0_11 = arith.constant 0 : index
      %c0_12 = arith.constant 0 : index
      %14 = vector.load %arg6[%c0_11, %c0_12] : memref<8x8xf32, #tpu.memory_space<vmem>>, vector<8x8xf32>
      tpu.vector_store %arg6[%c0_11, %c0_12], %13 {strides = array<i32>} : memref<8x8xf32, #tpu.memory_space<vmem>>, vector<8x8xf32>,
    } else {
    }
    %c0 = arith.constant 0 : index
    %c0_1 = arith.constant 0 : index
    %3 = vector.load %arg2[%c0, %c0_1] : memref<8x128xf32, #tpu.memory_space<vmem>>, vector<8x128xf32>
    %c0_2 = arith.constant 0 : index
    %c0_3 = arith.constant 0 : index
    %4 = vector.load %arg3[%c0_2, %c0_3] : memref<8x128xf32, #tpu.memory_space<vmem>>, vector<8x128xf32>
    %cst = arith.constant dense<0.000000e+00> : vector<8x8xf32>
    %5 = tpu.matmul %3, %4, %cst {dimension_numbers = #tpu.dot_dimension_numbers<[1], [1], [0], [0], [0, 0, 1, 0], [], []>} : vector<8x128xf32>, vector<8x128xf32>, vector<8x8xf32> -> vector<8x8xf32>
    %6 = math.exp %5 : vector<8x8xf32>
    %c0_4 = arith.constant 0 : index
    %c0_5 = arith.constant 0 : index
    %7 = vector.load %arg6[%c0_4, %c0_5] : memref<8x8xf32, #tpu.memory_space<vmem>>, vector<8x8xf32>
    %8 = arith.addf %7, %6 : vector<8x8xf32>
    %c0_6 = arith.constant 0 : index
    %c0_7 = arith.constant 0 : index
    %9 = vector.load %arg6[%c0_6, %c0_7] : memref<8x8xf32, #tpu.memory_space<vmem>>, vector<8x8xf32>
    tpu.vector_store %arg6[%c0_6, %c0_7], %8 {strides = array<i32>} : memref<8x8xf32, #tpu.memory_space<vmem>>, vector<8x8xf32>,
    %c0_i32_8 = arith.constant 0 : i32
    %10 = arith.cmpi eq, %arg1, %c0_i32_8 : i32
    %11 = arith.extui %10 : i1 to i32
    %c0_i32_9 = arith.constant 0 : i32
    %12 = arith.cmpi ne, %11, %c0_i32_9 : i32
    scf.if %12 {
      %c0_10 = arith.constant 0 : index
      %c0_11 = arith.constant 0 : index
      %13 = vector.load %arg4[%c0_10, %c0_11] : memref<8x128xf32, #tpu.memory_space<vmem>>, vector<8x128xf32>
      %14 = arith.mulf %3, %3 : vector<8x128xf32>
      %cst_12 = arith.constant dense<0.000000e+00> : vector<8xf32>
      %15 = vector.multi_reduction <add>, %14, %cst_12 [1] : vector<8x128xf32> to vector<8xf32>
      %16 = vector.shape_cast %15 : vector<8xf32> to vector<8x1xf32>
      %17 = arith.mulf %3, %13 : vector<8x128xf32>
      %cst_13 = arith.constant dense<0.000000e+00> : vector<8xf32>
      %18 = vector.multi_reduction <add>, %17, %cst_13 [1] : vector<8x128xf32> to vector<8xf32>
      %19 = vector.shape_cast %18 : vector<8xf32> to vector<8x1xf32>
      %c0_14 = arith.constant 0 : index
      %c0_15 = arith.constant 0 : index
      %20 = vector.load %arg6[%c0_14, %c0_15] : memref<8x8xf32, #tpu.memory_space<vmem>>, vector<8x8xf32>
      %cst_16 = arith.constant dense<0.000000e+00> : vector<8xf32>
      %21 = vector.multi_reduction <add>, %20, %cst_16 [1] : vector<8x8xf32> to vector<8xf32>
      %22 = vector.shape_cast %21 : vector<8xf32> to vector<8x1xf32>
      %23 = math.exp %16 : vector<8x1xf32>
      %24 = arith.subf %22, %23 : vector<8x1xf32>
      %25 = math.log %24 : vector<8x1xf32>
      %26 = arith.subf %25, %19 : vector<8x1xf32>
      %c0_17 = arith.constant 0 : index
      %c0_18 = arith.constant 0 : index
      %27 = vector.load %arg5[%c0_17, %c0_18] : memref<8x1xf32, #tpu.memory_space<vmem>>, vector<8x1xf32>
      tpu.vector_store %arg5[%c0_17, %c0_18], %26 {strides = array<i32>} : memref<8x1xf32, #tpu.memory_space<vmem>>, vector<8x1xf32>,
    } else {
    }
    return
  }
  func.func @transform_0(%arg0: i32, %arg1: i32) -> (i32, i32) {
    %c0_i32 = arith.constant 0 : i32
    %c0_i32_0 = arith.constant 0 : i32
    return %arg0, %c0_i32 : i32, i32
  }
  func.func @transform_1(%arg0: i32, %arg1: i32) -> (i32, i32) {
    %c0_i32 = arith.constant 0 : i32
    %c0_i32_0 = arith.constant 0 : i32
    return %arg1, %c0_i32 : i32, i32
  }
  func.func @transform_2(%arg0: i32, %arg1: i32) -> (i32, i32) {
    %c0_i32 = arith.constant 0 : i32
    %c0_i32_0 = arith.constant 0 : i32
    return %arg0, %c0_i32 : i32, i32
  }
  func.func @transform_3(%arg0: i32, %arg1: i32) -> (i32, i32) {
    %c0_i32 = arith.constant 0 : i32
    %c0_i32_0 = arith.constant 0 : i32
    return %arg0, %c0_i32 : i32, i32
  }
}

</mosaic_0001>

<bundles_post_ra>
// kernel: tpu_custom_call.1
= control target key start
LH: loop header
LB: loop body
LE: loop exit
PB: predicated region body
PF: predicated region fallthrough
CT: control target
= control target key end

     0   :  { %8 = vsyncpa [#allocation4], 0  ;;  %s242_s0 = inlined_call_operand.hbm [shape: f32[8,128], index: 0, kind: input, shape index: {}]   ;;  %s243_s1 = inlined_call_operand.hbm [shape: f32[8,128], index: 1, kind: input, shape index: {}]   ;;  %s244_s2 = inlined_call_operand.hbm [shape: f32[8,128], index: 2, kind: input, shape index: {}]   ;;  %s245_s3 = inlined_call_operand.vmem [shape: f32[8,1], index: 3, kind: output, shape index: {}]  }
   0x1   :  { %9 = vsyncpa [#allocation6], 0  ;;  %s26_s14 = sshll.u32 %s243_s1, 4  ;;  %s203_s15 = smov [#allocation5]   ;;  %s27_s14 = int_to_ptr.hbm [resolvable:$true] %s26_s14 }
   0x2   :  { %s28_s16 = sshll.u32 %s203_s15, 4  ;;  %s15_s19 = sshll.u32 %s242_s0, 4  ;;  %s29_s16 = int_to_ptr.vmem [resolvable:$true] %s28_s16  ;;  %s16_s19 = int_to_ptr.hbm [resolvable:$true] %s15_s19 }
   0x3   :  { %31 = dma.hbm_to_vmem [thread:$0]  %s27_s14, 128, %s29_s16, [#allocation6]  }
   0x4   :  { %s204_s20 = smov [#allocation3]   ;;  %s37_s24 = sshll.u32 %s244_s2, 4  ;;  %s38_s24 = int_to_ptr.hbm [resolvable:$true] %s37_s24 }
   0x5   :  { %s17_s21 = sshll.u32 %s204_s20, 4  ;;  %s205_s1 = smov [#allocation7]   ;;  %s18_s21 = int_to_ptr.vmem [resolvable:$true] %s17_s21 }
   0x6   :  { %20 = dma.hbm_to_vmem [thread:$0]  %s16_s19, 128, %s18_s21, [#allocation4]  }
   0x7   :  { %s39_s25 = sshll.u32 %s205_s1, 4  ;;  %s40_s25 = int_to_ptr.vmem [resolvable:$true] %s39_s25 }
   0x8   :  { %42 = dma.hbm_to_vmem [thread:$0]  %s38_s24, 128, %s40_s25, [#allocation6]  }
   0x9   :  { %199 = dma.done.wait [#allocation4], 128  }
   0xa   :  { %200 = vsyncadd [#allocation4], 4294967168 }
   0xb   :  { %201 = dma.done.wait [#allocation6], 256  }
   0xc   :  { %202 = vsyncadd [#allocation6], 4294967040  ;;  %v62_v0 = vld [vmem:[#allocation5] sm:$0xff]  ;;  %v61_v1 = vld [vmem:[#allocation3] sm:$0xff]  ;;  %vm59_vm0 = vcmask 64512   ;;  %v206_v2 = vmov 0.0  }
   0xd   :  { %78 = vmatpush.xpose.msra.mxu0 %v62_v0  ;;  %60 = vst.msk [vmem:[#allocation2] sm:$0xff] %vm59_vm0, %v206_v2  ;;  %v93_v3 = vmul.f32 %v61_v1, %v61_v1  ;;  %v92_v4 = vld [vmem:[#allocation7] sm:$0xff]  ;;  %vm109_vm1 = vcmask 7168  }
   0xe   :  { %v96_v5 = vmul.f32 %v92_v4, %v61_v1 }
   0xf   :  { %94 = vadd.xlane.f32.xlu0 %v93_v3 }
  0x10   :  { %79 = vmatmul.f32.vlgmr.msra.gmra.mxu0 %v61_v1  ;;  %97 = vadd.xlane.f32.xlu1 %v96_v5 }
  0x14   :  { %v85_v8 = vld [vmem:[#allocation2] sm:$0xff] }
  0x82   :  { %v95_v13 = vpop.xlane.xlu0 %94 }
  0x83   :  { %v103_v14 = vmul.f32 1.442695, %v95_v13  ;;  %v98_v19 = vpop.xlane.xlu1 %97 }
  0x8d   :  { %v80_v6 = vpop.f32.mrf.mxu0 }
  0x8e   :  { %v83_v7 = vmul.f32 1.442695, %v80_v6 }
  0x90   :  { %121 = vpow2.f32 %v83_v7 }
  0x91   :  { %123 = vpow2.f32 %v103_v14 }
  0x96   :  { %v122_v9 = vpop.eup %121 }
  0x97   :  { %v86_v10 = vadd.f32 %v122_v9, %v85_v8  ;;  %v124_v15 = vpop.eup %123 }
  0x99   :  { %88 = vst.msk [vmem:[#allocation2] sm:$0xff] %vm59_vm0, %v86_v10 }
  0xa0   :  { %v99_v11 = vld [vmem:[#allocation2] sm:$0xff] }
  0xa1   :  { %v100_v12 = vsel %vm59_vm0, %v99_v11, 0.0 }
  0xa2   :  { %101 = vadd.xlane.f32.xlu0 %v100_v12 }
 0x115   :  { %v102_v16 = vpop.xlane.xlu0 %101 }
 0x116   :  { %v105_v17 = vsub.f32 %v102_v16, %v124_v15 }
 0x118   :  { %125 = vlog2.f32 %v105_v17 }
 0x11e   :  { %v126_v18 = vpop.eup %125 }
 0x11f   :  { %v107_v20 = vmul.f32 0.6931472, %v126_v18 }
 0x121   :  { %v108_v21 = vsub.f32 %v107_v20, %v98_v19 }
 0x123   :  { %110 = vst.msk [vmem:[%s245_s3] sm:$0xff] %vm109_vm1, %v108_v21 }
 0x124   :  { %115 = vsyncpa [#allocation4], 1 }
 0x125   :  { %116 = vsyncpa [#allocation6], 1 }

</bundles_post_ra>
